<compile_context>
chip_gen: v7x
topology: tpu7x:2x2x1
jax: 0.10.0
libtpu: 0.0.40
codegen_flags: <defaults>
</compile_context>

<pallas_src>
import functools

import jax
import jax.numpy as jnp
from jax import lax
from jax.experimental import pallas as pl
from jax.experimental.pallas import tpu as pltpu


def _make_adv_kernel(B, S, D, H, OUT):
    """Build the kernel with all dims baked in as Python constants."""
    H3 = 3 * H
    # static row offsets inside the fused slab
    R_WI = 0
    R_WH = R_WI + D
    R_W1 = R_WH + H
    R_W2 = R_W1 + H
    R_BX = R_W2 + OUT
    R_BHN = R_BX + 1
    R_B1 = R_BHN + 1
    R_B2 = R_B1 + 1

    def kernel(x_ref,    # (S*B, D)  time-major input (whole sequence in VMEM)
               w_ref,    # (R, 3H)   fused weight/bias slab
               out_ref): # (B, OUT)
        # ---- unpack slab with static slices (cheap ref views / aligned loads) --
        wi = w_ref[R_WI:R_WI + D, :]            # (D, 3H)  [r | z | n]
        wh = w_ref[R_WH:R_WH + H, :]            # (H, 3H)  [r | z | n]
        w1 = w_ref[R_W1:R_W1 + H, :H]           # (H, H)   fc1 (pre-transposed)
        w2t = w_ref[R_W2:R_W2 + OUT, :H]        # (OUT, H) fc2 rows
        b_x = w_ref[R_BX:R_BX + 1, :]           # (1, 3H)  b_ir+b_hr | b_iz+b_hz | b_in
        b_hn = w_ref[R_BHN:R_BHN + 1, :H]       # (1, H)
        b1 = w_ref[R_B1:R_B1 + 1, :H]           # (1, H)
        b2 = w_ref[R_B2:R_B2 + 1, :OUT]         # (1, OUT)

        # ---- prologue: hoist the input projection off the serial chain --------
        # One fused MXU push covers all S timesteps and all three gates.
        x_proj = jnp.dot(x_ref[...], wi,
                         preferred_element_type=jnp.float32) + b_x          # (S*B, 3H)

        # hoisted broadcast (not CSE'd if left inside the unrolled loop)
        b_hn_b = jnp.broadcast_to(b_hn, (B, H))                             # (B, H)

        # ---- GRU recurrence, fully unrolled (S is a compile-time constant) ----
        h = jnp.zeros((B, H), jnp.float32)
        for t in range(S):
            xp = x_proj[t * B:(t + 1) * B, :]                               # (B, 3H)
            hp = jnp.dot(h, wh, preferred_element_type=jnp.float32)         # (B, 3H)
            # one sigmoid over the full gate vreg; r, z sliced from it
            sg = jax.nn.sigmoid(xp + hp)                                    # (B, 3H)
            r = sg[:, :H]
            z = sg[:, H:2 * H]
            n = jnp.tanh(xp[:, 2 * H:] + r * (hp[:, 2 * H:] + b_hn_b))
            h = (1.0 - z) * n + z * h

        # ---- heads: relu(fc1) -> relu(fc2) -------------------------------------
        y1 = jnp.maximum(
            jnp.dot(h, w1, preferred_element_type=jnp.float32) + b1, 0.0)   # (B, H)

        # fc2 with tiny OUT: VPU broadcast-multiply + lane reduction (no MXU push)
        cols = [jnp.sum(y1 * w2t[o:o + 1, :], axis=-1, keepdims=True)
                for o in range(OUT)]                                        # OUT x (B,1)
        y2 = cols[0] if OUT == 1 else jnp.concatenate(cols, axis=-1)        # (B, OUT)
        out_ref[...] = jnp.maximum(y2 + b2, 0.0).astype(out_ref.dtype)

    return kernel


def fuse_adv_params(params):
    """One-time fusion of all weights/biases into a single (R, 3H) f32 slab.

    Row layout:
      [0:D)        wi  = [W_ir | W_iz | W_in]^T            (D, 3H)
      [D:D+H)      wh  = [W_hr | W_hz | W_hn]^T            (H, 3H)
      [D+H:D+2H)   w1^T padded to 3H cols                  (H, 3H)
      [D+2H:+OUT)  w2^T padded to 3H cols                  (OUT, 3H)
      next 4 rows  b_x | b_hn | b1 | b2 (each padded)      (4, 3H)
      rows padded to a multiple of 8.
    """
    H = params["w_hr"].shape[0]
    H3 = 3 * H

    wi = jnp.concatenate([params["w_ir"], params["w_iz"], params["w_in"]], axis=0).T
    wh = jnp.concatenate([params["w_hr"], params["w_hz"], params["w_hn"]], axis=0).T
    w1 = params["w1"].T                       # (H, H)
    w2t = params["w2"].T                      # (OUT, H)
    b_x = jnp.concatenate([params["b_ir"] + params["b_hr"],
                           params["b_iz"] + params["b_hz"],
                           params["b_in"]])   # (3H,)

    def pad_cols(a):
        return jnp.pad(a, ((0, 0), (0, H3 - a.shape[1])))

    slab = jnp.concatenate(
        [wi.astype(jnp.float32),
         wh.astype(jnp.float32),
         pad_cols(w1.astype(jnp.float32)),
         pad_cols(w2t.astype(jnp.float32)),
         b_x[None, :].astype(jnp.float32),
         pad_cols(params["b_hn"][None, :].astype(jnp.float32)),
         pad_cols(params["b1"][None, :].astype(jnp.float32)),
         pad_cols(params["b2"][None, :].astype(jnp.float32))],
        axis=0)
    pad_rows = (-slab.shape[0]) % 8
    if pad_rows:
        slab = jnp.pad(slab, ((0, pad_rows), (0, 0)))
    return slab


@functools.partial(jax.jit, static_argnames=("out_dim",))
def adv_forward(x, slab, *, out_dim=1):
    """x: (batch, seq, dim_l) f32; slab: fused params -> (batch, out_dim) f32."""
    B, S, D = x.shape
    H = slab.shape[1] // 3

    # time-major layout done in XLA (tiny transpose, effectively free)
    x_tm = jnp.swapaxes(x, 0, 1).reshape(S * B, D)

    kernel = _make_adv_kernel(B, S, D, H, out_dim)
    vmem = pl.BlockSpec(memory_space=pltpu.MemorySpace.VMEM)
    return pl.pallas_call(
        kernel,
        out_shape=jax.ShapeDtypeStruct((B, out_dim), jnp.float32),
        in_specs=[vmem, vmem],
        out_specs=vmem,
    )(x_tm, slab)


def reference_forward(x, params):
    """Pure-JAX reference (mirrors torch.nn.GRU + Linear math) for validation."""
    x_tm = jnp.transpose(x, (1, 0, 2))       # (S, B, D)
    H = params["w_hr"].shape[0]
    h0 = jnp.zeros((x.shape[0], H), jnp.float32)

    def step(h, x_t):
        r = jax.nn.sigmoid(x_t @ params["w_ir"].T + params["b_ir"]
                           + h @ params["w_hr"].T + params["b_hr"])
        z = jax.nn.sigmoid(x_t @ params["w_iz"].T + params["b_iz"]
                           + h @ params["w_hz"].T + params["b_hz"])
        n = jnp.tanh(x_t @ params["w_in"].T + params["b_in"]
                     + r * (h @ params["w_hn"].T + params["b_hn"]))
        h_new = (1.0 - z) * n + z * h
        return h_new, None

    h_last, _ = lax.scan(step, h0, x_tm)
    y = jnp.maximum(h_last @ params["w1"].T + params["b1"], 0.0)
    y = jnp.maximum(y @ params["w2"] + params["b2"], 0.0)
    return y


def init_params(key, dim_l, h, out_dim):
    """Deterministic init, PyTorch-style uniform(-1/sqrt(h), 1/sqrt(h))."""
    ks = jax.random.split(key, 16)
    s = 1.0 / jnp.sqrt(h)
    u = lambda k, shape: jax.random.uniform(k, shape, jnp.float32, -s, s)
    return {
        "w_ir": u(ks[0], (h, dim_l)), "w_iz": u(ks[1], (h, dim_l)), "w_in": u(ks[2], (h, dim_l)),
        "w_hr": u(ks[3], (h, h)),     "w_hz": u(ks[4], (h, h)),     "w_hn": u(ks[5], (h, h)),
        "b_ir": u(ks[6], (h,)), "b_iz": u(ks[7], (h,)), "b_in": u(ks[8], (h,)),
        "b_hr": u(ks[9], (h,)), "b_hz": u(ks[10], (h,)), "b_hn": u(ks[11], (h,)),
        "w1": u(ks[12], (h, h)), "b1": u(ks[13], (h,)),
        # fc2 stored already transposed as (h, out_dim)
        "w2": u(ks[14], (h, out_dim)), "b2": u(ks[15], (out_dim,)),
    }


if __name__ == "__main__":
    # small shapes implied by the module: gc.dim_l=32, adv_h_dim=32, out_dim=1
    B, S, D, H, OUT = 2, 8, 32, 32, 1

    key = jax.random.PRNGKey(0)
    kx, kp = jax.random.split(key)
    x = jax.random.normal(kx, (B, S, D), jnp.float32)
    params = init_params(kp, D, H, OUT)

    # one-time parameter fusion (off the per-call hot path)
    slab = jax.block_until_ready(fuse_adv_params(params))

    out = jax.block_until_ready(adv_forward(x, slab, out_dim=OUT))
    ref = jax.block_until_ready(reference_forward(x, params))

    assert out.shape == (B, OUT), out.shape
    assert jnp.allclose(out, ref, atol=1e-4, rtol=1e-4), (out, ref)

    print("KERNEL_OK")
</pallas_src>

<mosaic_0001>
module attributes {stable_mosaic.version = 11 : i64} {
  func.func @kernel(%arg0: memref<16x32xf32, #tpu.memory_space<vmem>>, %arg1: memref<104x96xf32, #tpu.memory_space<vmem>>, %arg2: memref<2x1xf32, #tpu.memory_space<vmem>>) attributes {dimension_semantics = [], scalar_prefetch = 0 : i64, scratch_operands = 0 : i64, tpu.core_type = #tpu.core_type<tc>} {
    %c0 = arith.constant 0 : index
    %c0_0 = arith.constant 0 : index
    %0 = vector.load %arg1[%c0, %c0_0] : memref<104x96xf32, #tpu.memory_space<vmem>>, vector<32x96xf32>
    %c32 = arith.constant 32 : index
    %c0_1 = arith.constant 0 : index
    %1 = vector.load %arg1[%c32, %c0_1] : memref<104x96xf32, #tpu.memory_space<vmem>>, vector<32x96xf32>
    %c64 = arith.constant 64 : index
    %c0_2 = arith.constant 0 : index
    %2 = vector.load %arg1[%c64, %c0_2] : memref<104x96xf32, #tpu.memory_space<vmem>>, vector<32x32xf32>
    %c96 = arith.constant 96 : index
    %c0_3 = arith.constant 0 : index
    %3 = vector.load %arg1[%c96, %c0_3] : memref<104x96xf32, #tpu.memory_space<vmem>>, vector<1x32xf32>
    %c97 = arith.constant 97 : index
    %c0_4 = arith.constant 0 : index
    %4 = vector.load %arg1[%c97, %c0_4] : memref<104x96xf32, #tpu.memory_space<vmem>>, vector<1x96xf32>
    %c98 = arith.constant 98 : index
    %c0_5 = arith.constant 0 : index
    %5 = vector.load %arg1[%c98, %c0_5] : memref<104x96xf32, #tpu.memory_space<vmem>>, vector<1x32xf32>
    %c99 = arith.constant 99 : index
    %c0_6 = arith.constant 0 : index
    %6 = vector.load %arg1[%c99, %c0_6] : memref<104x96xf32, #tpu.memory_space<vmem>>, vector<1x32xf32>
    %c100 = arith.constant 100 : index
    %c0_7 = arith.constant 0 : index
    %7 = vector.load %arg1[%c100, %c0_7] : memref<104x96xf32, #tpu.memory_space<vmem>>, vector<1x1xf32>
    %c0_8 = arith.constant 0 : index
    %c0_9 = arith.constant 0 : index
    %8 = vector.load %arg0[%c0_8, %c0_9] : memref<16x32xf32, #tpu.memory_space<vmem>>, vector<16x32xf32>
    %cst = arith.constant dense<0.000000e+00> : vector<16x96xf32>
    %9 = tpu.matmul %8, %0, %cst {dimension_numbers = #tpu.dot_dimension_numbers<[1], [0], [0], [1], [0, 0, 1, 1], [], []>} : vector<16x32xf32>, vector<32x96xf32>, vector<16x96xf32> -> vector<16x96xf32>
    %10 = vector.broadcast %4 : vector<1x96xf32> to vector<16x96xf32>
    %11 = arith.addf %9, %10 : vector<16x96xf32>
    %12 = vector.shape_cast %5 : vector<1x32xf32> to vector<1x32xf32>
    %13 = vector.broadcast %12 : vector<1x32xf32> to vector<2x32xf32>
    %cst_10 = arith.constant 0.000000e+00 : f32
    %14 = vector.broadcast %cst_10 : f32 to vector<2x32xf32>
    %15 = vector.extract_strided_slice %11 {offsets = [0, 0], sizes = [2, 96], strides = [1, 1]} : vector<16x96xf32> to vector<2x96xf32>
    %cst_11 = arith.constant dense<0.000000e+00> : vector<2x96xf32>
    %16 = tpu.matmul %14, %1, %cst_11 {dimension_numbers = #tpu.dot_dimension_numbers<[1], [0], [0], [1], [0, 0, 1, 1], [], []>} : vector<2x32xf32>, vector<32x96xf32>, vector<2x96xf32> -> vector<2x96xf32>
    %17 = arith.addf %15, %16 : vector<2x96xf32>
    %18 = arith.negf %17 : vector<2x96xf32>
    %19 = math.exp %18 : vector<2x96xf32>
    %cst_12 = arith.constant 1.000000e+00 : f32
    %20 = vector.broadcast %cst_12 : f32 to vector<2x96xf32>
    %21 = arith.addf %20, %19 : vector<2x96xf32>
    %22 = arith.divf %20, %21 : vector<2x96xf32>
    %23 = vector.extract_strided_slice %22 {offsets = [0, 0], sizes = [2, 32], strides = [1, 1]} : vector<2x96xf32> to vector<2x32xf32>
    %24 = vector.extract_strided_slice %22 {offsets = [0, 32], sizes = [2, 32], strides = [1, 1]} : vector<2x96xf32> to vector<2x32xf32>
    %25 = vector.extract_strided_slice %15 {offsets = [0, 64], sizes = [2, 32], strides = [1, 1]} : vector<2x96xf32> to vector<2x32xf32>
    %26 = vector.extract_strided_slice %16 {offsets = [0, 64], sizes = [2, 32], strides = [1, 1]} : vector<2x96xf32> to vector<2x32xf32>
    %27 = arith.addf %26, %13 : vector<2x32xf32>
    %28 = arith.mulf %23, %27 : vector<2x32xf32>
    %29 = arith.addf %25, %28 : vector<2x32xf32>
    %30 = math.tanh %29 : vector<2x32xf32>
    %cst_13 = arith.constant 1.000000e+00 : f32
    %31 = vector.broadcast %cst_13 : f32 to vector<2x32xf32>
    %32 = arith.subf %31, %24 : vector<2x32xf32>
    %33 = arith.mulf %32, %30 : vector<2x32xf32>
    %34 = arith.mulf %24, %14 : vector<2x32xf32>
    %35 = arith.addf %33, %34 : vector<2x32xf32>
    %36 = vector.extract_strided_slice %11 {offsets = [2, 0], sizes = [2, 96], strides = [1, 1]} : vector<16x96xf32> to vector<2x96xf32>
    %cst_14 = arith.constant dense<0.000000e+00> : vector<2x96xf32>
    %37 = tpu.matmul %35, %1, %cst_14 {dimension_numbers = #tpu.dot_dimension_numbers<[1], [0], [0], [1], [0, 0, 1, 1], [], []>} : vector<2x32xf32>, vector<32x96xf32>, vector<2x96xf32> -> vector<2x96xf32>
    %38 = arith.addf %36, %37 : vector<2x96xf32>
    %39 = arith.negf %38 : vector<2x96xf32>
    %40 = math.exp %39 : vector<2x96xf32>
    %cst_15 = arith.constant 1.000000e+00 : f32
    %41 = vector.broadcast %cst_15 : f32 to vector<2x96xf32>
    %42 = arith.addf %41, %40 : vector<2x96xf32>
    %43 = arith.divf %41, %42 : vector<2x96xf32>
    %44 = vector.extract_strided_slice %43 {offsets = [0, 0], sizes = [2, 32], strides = [1, 1]} : vector<2x96xf32> to vector<2x32xf32>
    %45 = vector.extract_strided_slice %43 {offsets = [0, 32], sizes = [2, 32], strides = [1, 1]} : vector<2x96xf32> to vector<2x32xf32>
    %46 = vector.extract_strided_slice %36 {offsets = [0, 64], sizes = [2, 32], strides = [1, 1]} : vector<2x96xf32> to vector<2x32xf32>
    %47 = vector.extract_strided_slice %37 {offsets = [0, 64], sizes = [2, 32], strides = [1, 1]} : vector<2x96xf32> to vector<2x32xf32>
    %48 = arith.addf %47, %13 : vector<2x32xf32>
    %49 = arith.mulf %44, %48 : vector<2x32xf32>
    %50 = arith.addf %46, %49 : vector<2x32xf32>
    %51 = math.tanh %50 : vector<2x32xf32>
    %cst_16 = arith.constant 1.000000e+00 : f32
    %52 = vector.broadcast %cst_16 : f32 to vector<2x32xf32>
    %53 = arith.subf %52, %45 : vector<2x32xf32>
    %54 = arith.mulf %53, %51 : vector<2x32xf32>
    %55 = arith.mulf %45, %35 : vector<2x32xf32>
    %56 = arith.addf %54, %55 : vector<2x32xf32>
    %57 = vector.extract_strided_slice %11 {offsets = [4, 0], sizes = [2, 96], strides = [1, 1]} : vector<16x96xf32> to vector<2x96xf32>
    %cst_17 = arith.constant dense<0.000000e+00> : vector<2x96xf32>
    %58 = tpu.matmul %56, %1, %cst_17 {dimension_numbers = #tpu.dot_dimension_numbers<[1], [0], [0], [1], [0, 0, 1, 1], [], []>} : vector<2x32xf32>, vector<32x96xf32>, vector<2x96xf32> -> vector<2x96xf32>
    %59 = arith.addf %57, %58 : vector<2x96xf32>
    %60 = arith.negf %59 : vector<2x96xf32>
    %61 = math.exp %60 : vector<2x96xf32>
    %cst_18 = arith.constant 1.000000e+00 : f32
    %62 = vector.broadcast %cst_18 : f32 to vector<2x96xf32>
    %63 = arith.addf %62, %61 : vector<2x96xf32>
    %64 = arith.divf %62, %63 : vector<2x96xf32>
    %65 = vector.extract_strided_slice %64 {offsets = [0, 0], sizes = [2, 32], strides = [1, 1]} : vector<2x96xf32> to vector<2x32xf32>
    %66 = vector.extract_strided_slice %64 {offsets = [0, 32], sizes = [2, 32], strides = [1, 1]} : vector<2x96xf32> to vector<2x32xf32>
    %67 = vector.extract_strided_slice %57 {offsets = [0, 64], sizes = [2, 32], strides = [1, 1]} : vector<2x96xf32> to vector<2x32xf32>
    %68 = vector.extract_strided_slice %58 {offsets = [0, 64], sizes = [2, 32], strides = [1, 1]} : vector<2x96xf32> to vector<2x32xf32>
    %69 = arith.addf %68, %13 : vector<2x32xf32>
    %70 = arith.mulf %65, %69 : vector<2x32xf32>
    %71 = arith.addf %67, %70 : vector<2x32xf32>
    %72 = math.tanh %71 : vector<2x32xf32>
    %cst_19 = arith.constant 1.000000e+00 : f32
    %73 = vector.broadcast %cst_19 : f32 to vector<2x32xf32>
    %74 = arith.subf %73, %66 : vector<2x32xf32>
    %75 = arith.mulf %74, %72 : vector<2x32xf32>
    %76 = arith.mulf %66, %56 : vector<2x32xf32>
    %77 = arith.addf %75, %76 : vector<2x32xf32>
    %78 = vector.extract_strided_slice %11 {offsets = [6, 0], sizes = [2, 96], strides = [1, 1]} : vector<16x96xf32> to vector<2x96xf32>
    %cst_20 = arith.constant dense<0.000000e+00> : vector<2x96xf32>
    %79 = tpu.matmul %77, %1, %cst_20 {dimension_numbers = #tpu.dot_dimension_numbers<[1], [0], [0], [1], [0, 0, 1, 1], [], []>} : vector<2x32xf32>, vector<32x96xf32>, vector<2x96xf32> -> vector<2x96xf32>
    %80 = arith.addf %78, %79 : vector<2x96xf32>
    %81 = arith.negf %80 : vector<2x96xf32>
    %82 = math.exp %81 : vector<2x96xf32>
    %cst_21 = arith.constant 1.000000e+00 : f32
    %83 = vector.broadcast %cst_21 : f32 to vector<2x96xf32>
    %84 = arith.addf %83, %82 : vector<2x96xf32>
    %85 = arith.divf %83, %84 : vector<2x96xf32>
    %86 = vector.extract_strided_slice %85 {offsets = [0, 0], sizes = [2, 32], strides = [1, 1]} : vector<2x96xf32> to vector<2x32xf32>
    %87 = vector.extract_strided_slice %85 {offsets = [0, 32], sizes = [2, 32], strides = [1, 1]} : vector<2x96xf32> to vector<2x32xf32>
    %88 = vector.extract_strided_slice %78 {offsets = [0, 64], sizes = [2, 32], strides = [1, 1]} : vector<2x96xf32> to vector<2x32xf32>
    %89 = vector.extract_strided_slice %79 {offsets = [0, 64], sizes = [2, 32], strides = [1, 1]} : vector<2x96xf32> to vector<2x32xf32>
    %90 = arith.addf %89, %13 : vector<2x32xf32>
    %91 = arith.mulf %86, %90 : vector<2x32xf32>
    %92 = arith.addf %88, %91 : vector<2x32xf32>
    %93 = math.tanh %92 : vector<2x32xf32>
    %cst_22 = arith.constant 1.000000e+00 : f32
    %94 = vector.broadcast %cst_22 : f32 to vector<2x32xf32>
    %95 = arith.subf %94, %87 : vector<2x32xf32>
    %96 = arith.mulf %95, %93 : vector<2x32xf32>
    %97 = arith.mulf %87, %77 : vector<2x32xf32>
    %98 = arith.addf %96, %97 : vector<2x32xf32>
    %99 = vector.extract_strided_slice %11 {offsets = [8, 0], sizes = [2, 96], strides = [1, 1]} : vector<16x96xf32> to vector<2x96xf32>
    %cst_23 = arith.constant dense<0.000000e+00> : vector<2x96xf32>
    %100 = tpu.matmul %98, %1, %cst_23 {dimension_numbers = #tpu.dot_dimension_numbers<[1], [0], [0], [1], [0, 0, 1, 1], [], []>} : vector<2x32xf32>, vector<32x96xf32>, vector<2x96xf32> -> vector<2x96xf32>
    %101 = arith.addf %99, %100 : vector<2x96xf32>
    %102 = arith.negf %101 : vector<2x96xf32>
    %103 = math.exp %102 : vector<2x96xf32>
    %cst_24 = arith.constant 1.000000e+00 : f32
    %104 = vector.broadcast %cst_24 : f32 to vector<2x96xf32>
    %105 = arith.addf %104, %103 : vector<2x96xf32>
    %106 = arith.divf %104, %105 : vector<2x96xf32>
    %107 = vector.extract_strided_slice %106 {offsets = [0, 0], sizes = [2, 32], strides = [1, 1]} : vector<2x96xf32> to vector<2x32xf32>
    %108 = vector.extract_strided_slice %106 {offsets = [0, 32], sizes = [2, 32], strides = [1, 1]} : vector<2x96xf32> to vector<2x32xf32>
    %109 = vector.extract_strided_slice %99 {offsets = [0, 64], sizes = [2, 32], strides = [1, 1]} : vector<2x96xf32> to vector<2x32xf32>
    %110 = vector.extract_strided_slice %100 {offsets = [0, 64], sizes = [2, 32], strides = [1, 1]} : vector<2x96xf32> to vector<2x32xf32>
    %111 = arith.addf %110, %13 : vector<2x32xf32>
    %112 = arith.mulf %107, %111 : vector<2x32xf32>
    %113 = arith.addf %109, %112 : vector<2x32xf32>
    %114 = math.tanh %113 : vector<2x32xf32>
    %cst_25 = arith.constant 1.000000e+00 : f32
    %115 = vector.broadcast %cst_25 : f32 to vector<2x32xf32>
    %116 = arith.subf %115, %108 : vector<2x32xf32>
    %117 = arith.mulf %116, %114 : vector<2x32xf32>
    %118 = arith.mulf %108, %98 : vector<2x32xf32>
    %119 = arith.addf %117, %118 : vector<2x32xf32>
    %120 = vector.extract_strided_slice %11 {offsets = [10, 0], sizes = [2, 96], strides = [1, 1]} : vector<16x96xf32> to vector<2x96xf32>
    %cst_26 = arith.constant dense<0.000000e+00> : vector<2x96xf32>
    %121 = tpu.matmul %119, %1, %cst_26 {dimension_numbers = #tpu.dot_dimension_numbers<[1], [0], [0], [1], [0, 0, 1, 1], [], []>} : vector<2x32xf32>, vector<32x96xf32>, vector<2x96xf32> -> vector<2x96xf32>
    %122 = arith.addf %120, %121 : vector<2x96xf32>
    %123 = arith.negf %122 : vector<2x96xf32>
    %124 = math.exp %123 : vector<2x96xf32>
    %cst_27 = arith.constant 1.000000e+00 : f32
    %125 = vector.broadcast %cst_27 : f32 to vector<2x96xf32>
    %126 = arith.addf %125, %124 : vector<2x96xf32>
    %127 = arith.divf %125, %126 : vector<2x96xf32>
    %128 = vector.extract_strided_slice %127 {offsets = [0, 0], sizes = [2, 32], strides = [1, 1]} : vector<2x96xf32> to vector<2x32xf32>
    %129 = vector.extract_strided_slice %127 {offsets = [0, 32], sizes = [2, 32], strides = [1, 1]} : vector<2x96xf32> to vector<2x32xf32>
    %130 = vector.extract_strided_slice %120 {offsets = [0, 64], sizes = [2, 32], strides = [1, 1]} : vector<2x96xf32> to vector<2x32xf32>
    %131 = vector.extract_strided_slice %121 {offsets = [0, 64], sizes = [2, 32], strides = [1, 1]} : vector<2x96xf32> to vector<2x32xf32>
    %132 = arith.addf %131, %13 : vector<2x32xf32>
    %133 = arith.mulf %128, %132 : vector<2x32xf32>
    %134 = arith.addf %130, %133 : vector<2x32xf32>
    %135 = math.tanh %134 : vector<2x32xf32>
    %cst_28 = arith.constant 1.000000e+00 : f32
    %136 = vector.broadcast %cst_28 : f32 to vector<2x32xf32>
    %137 = arith.subf %136, %129 : vector<2x32xf32>
    %138 = arith.mulf %137, %135 : vector<2x32xf32>
    %139 = arith.mulf %129, %119 : vector<2x32xf32>
    %140 = arith.addf %138, %139 : vector<2x32xf32>
    %141 = vector.extract_strided_slice %11 {offsets = [12, 0], sizes = [2, 96], strides = [1, 1]} : vector<16x96xf32> to vector<2x96xf32>
    %cst_29 = arith.constant dense<0.000000e+00> : vector<2x96xf32>
    %142 = tpu.matmul %140, %1, %cst_29 {dimension_numbers = #tpu.dot_dimension_numbers<[1], [0], [0], [1], [0, 0, 1, 1], [], []>} : vector<2x32xf32>, vector<32x96xf32>, vector<2x96xf32> -> vector<2x96xf32>
    %143 = arith.addf %141, %142 : vector<2x96xf32>
    %144 = arith.negf %143 : vector<2x96xf32>
    %145 = math.exp %144 : vector<2x96xf32>
    %cst_30 = arith.constant 1.000000e+00 : f32
    %146 = vector.broadcast %cst_30 : f32 to vector<2x96xf32>
    %147 = arith.addf %146, %145 : vector<2x96xf32>
    %148 = arith.divf %146, %147 : vector<2x96xf32>
    %149 = vector.extract_strided_slice %148 {offsets = [0, 0], sizes = [2, 32], strides = [1, 1]} : vector<2x96xf32> to vector<2x32xf32>
    %150 = vector.extract_strided_slice %148 {offsets = [0, 32], sizes = [2, 32], strides = [1, 1]} : vector<2x96xf32> to vector<2x32xf32>
    %151 = vector.extract_strided_slice %141 {offsets = [0, 64], sizes = [2, 32], strides = [1, 1]} : vector<2x96xf32> to vector<2x32xf32>
    %152 = vector.extract_strided_slice %142 {offsets = [0, 64], sizes = [2, 32], strides = [1, 1]} : vector<2x96xf32> to vector<2x32xf32>
    %153 = arith.addf %152, %13 : vector<2x32xf32>
    %154 = arith.mulf %149, %153 : vector<2x32xf32>
    %155 = arith.addf %151, %154 : vector<2x32xf32>
    %156 = math.tanh %155 : vector<2x32xf32>
    %cst_31 = arith.constant 1.000000e+00 : f32
    %157 = vector.broadcast %cst_31 : f32 to vector<2x32xf32>
    %158 = arith.subf %157, %150 : vector<2x32xf32>
    %159 = arith.mulf %158, %156 : vector<2x32xf32>
    %160 = arith.mulf %150, %140 : vector<2x32xf32>
    %161 = arith.addf %159, %160 : vector<2x32xf32>
    %162 = vector.extract_strided_slice %11 {offsets = [14, 0], sizes = [2, 96], strides = [1, 1]} : vector<16x96xf32> to vector<2x96xf32>
    %cst_32 = arith.constant dense<0.000000e+00> : vector<2x96xf32>
    %163 = tpu.matmul %161, %1, %cst_32 {dimension_numbers = #tpu.dot_dimension_numbers<[1], [0], [0], [1], [0, 0, 1, 1], [], []>} : vector<2x32xf32>, vector<32x96xf32>, vector<2x96xf32> -> vector<2x96xf32>
    %164 = arith.addf %162, %163 : vector<2x96xf32>
    %165 = arith.negf %164 : vector<2x96xf32>
    %166 = math.exp %165 : vector<2x96xf32>
    %cst_33 = arith.constant 1.000000e+00 : f32
    %167 = vector.broadcast %cst_33 : f32 to vector<2x96xf32>
    %168 = arith.addf %167, %166 : vector<2x96xf32>
    %169 = arith.divf %167, %168 : vector<2x96xf32>
    %170 = vector.extract_strided_slice %169 {offsets = [0, 0], sizes = [2, 32], strides = [1, 1]} : vector<2x96xf32> to vector<2x32xf32>
    %171 = vector.extract_strided_slice %169 {offsets = [0, 32], sizes = [2, 32], strides = [1, 1]} : vector<2x96xf32> to vector<2x32xf32>
    %172 = vector.extract_strided_slice %162 {offsets = [0, 64], sizes = [2, 32], strides = [1, 1]} : vector<2x96xf32> to vector<2x32xf32>
    %173 = vector.extract_strided_slice %163 {offsets = [0, 64], sizes = [2, 32], strides = [1, 1]} : vector<2x96xf32> to vector<2x32xf32>
    %174 = arith.addf %173, %13 : vector<2x32xf32>
    %175 = arith.mulf %170, %174 : vector<2x32xf32>
    %176 = arith.addf %172, %175 : vector<2x32xf32>
    %177 = math.tanh %176 : vector<2x32xf32>
    %cst_34 = arith.constant 1.000000e+00 : f32
    %178 = vector.broadcast %cst_34 : f32 to vector<2x32xf32>
    %179 = arith.subf %178, %171 : vector<2x32xf32>
    %180 = arith.mulf %179, %177 : vector<2x32xf32>
    %181 = arith.mulf %171, %161 : vector<2x32xf32>
    %182 = arith.addf %180, %181 : vector<2x32xf32>
    %cst_35 = arith.constant dense<0.000000e+00> : vector<2x32xf32>
    %183 = tpu.matmul %182, %2, %cst_35 {dimension_numbers = #tpu.dot_dimension_numbers<[1], [0], [0], [1], [0, 0, 1, 1], [], []>} : vector<2x32xf32>, vector<32x32xf32>, vector<2x32xf32> -> vector<2x32xf32>
    %184 = vector.broadcast %6 : vector<1x32xf32> to vector<2x32xf32>
    %185 = arith.addf %183, %184 : vector<2x32xf32>
    %cst_36 = arith.constant 0.000000e+00 : f32
    %186 = vector.broadcast %cst_36 : f32 to vector<2x32xf32>
    %187 = arith.maximumf %185, %186 : vector<2x32xf32>
    %188 = vector.broadcast %3 : vector<1x32xf32> to vector<2x32xf32>
    %189 = arith.mulf %187, %188 : vector<2x32xf32>
    %cst_37 = arith.constant dense<0.000000e+00> : vector<2xf32>
    %190 = vector.multi_reduction <add>, %189, %cst_37 [1] : vector<2x32xf32> to vector<2xf32>
    %191 = vector.shape_cast %190 : vector<2xf32> to vector<2x1xf32>
    %192 = vector.broadcast %7 : vector<1x1xf32> to vector<2x1xf32>
    %193 = arith.addf %191, %192 : vector<2x1xf32>
    %cst_38 = arith.constant 0.000000e+00 : f32
    %194 = vector.broadcast %cst_38 : f32 to vector<2x1xf32>
    %195 = arith.maximumf %193, %194 : vector<2x1xf32>
    %c0_39 = arith.constant 0 : index
    %c0_40 = arith.constant 0 : index
    %196 = vector.load %arg2[%c0_39, %c0_40] : memref<2x1xf32, #tpu.memory_space<vmem>>, vector<2x1xf32>
    tpu.vector_store %arg2[%c0_39, %c0_40], %195 {strides = array<i32>} : memref<2x1xf32, #tpu.memory_space<vmem>>, vector<2x1xf32>,
    return
  }
}

</mosaic_0001>

<bundles_post_ra>
// kernel: adv_forward.1
= control target key start
LH: loop header
LB: loop body
LE: loop exit
PB: predicated region body
PF: predicated region fallthrough
CT: control target
= control target key end

     0   :  { %v1381_v0 = vmov 0.0|0.0   ;;  %vm1382_vm0 = vmmov 0   ;;  %v1383_v4 = vmov 0.0   ;;  %vm34_vm1 = vcmask 261120   ;;  %s1384_s29 = smov 64   ;;  %s1385_s5 = smov 96   ;;  %s1591_s1 = inlined_call_operand.vmem [shape: f32[104,96], index: 1, kind: input, shape index: {}]   ;;  %s1592_s0 = inlined_call_operand.vmem [shape: f32[16,32], index: 0, kind: input, shape index: {}]   ;;  %s1593_s2 = inlined_call_operand.vmem [shape: f32[2,1], index: 2, kind: output, shape index: {}]  }
   0x1   :  { %1274 = vmatprep.subr.bf16.mxu1 %v1381_v0  ;;  %v11_v1 = vld [vmem:[%s1591_s1] sm:$0xff]  ;;  %v12_v2 = vld [vmem:[%s1591_s1 + $0x8] sm:$0xff]  ;;  %1175 = vmatprep.mubr.msk.f32.mxu1 %vm1382_vm0, %v1383_v4  ;;  %v13_v7 = vld [vmem:[%s1591_s1 + $0x10] sm:$0xff]  ;;  %vm1066_vm2 = vcmask 254976   ;;  %vm1076_vm3 = vcmask 1024  }
   0x2   :  { %v15_v3 = vld [vmem:[%s1591_s1 + $0x20] sm:$0xff]  ;;  %v1266_v5 = vpack.c.bf16 %v12_v2, %v11_v1  ;;  %v16_v6 = vld [vmem:[%s1591_s1 + $0x28] sm:$0xff]  ;;  %v14_v8 = vld [vmem:[%s1591_s1 + $0x18] sm:$0xff] }
   0x3   :  { %v1422_v9 = vpack.c.bf16 %v16_v6, %v15_v3  ;;  %v1270_v10 = vpack.c.bf16 %v14_v8, %v13_v7  ;;  %v17_v11 = vld [vmem:[%s1591_s1 + $0x30] sm:$0xff]  ;;  %v18_v12 = vld [vmem:[%s1591_s1 + $0x38] sm:$0xff]  ;;  %v28_v13 = vld [vmem:[%s1592_s0] sm:$0xff] }
   0x4   :  { %1267 = vmatprep.subr.bf16.mxu0 %v1266_v5  ;;  %1164 = vmatprep.mubr.msk.f32.mxu0 %vm34_vm1, %v28_v13  ;;  %v1085_v14 = vld [vmem:[%s1591_s1 + $0x62] ss:$0 sm:$0xff]  ;;  %v1438_v15 = vpack.c.bf16 %v18_v12, %v17_v11  ;;  %v29_v16 = vld [vmem:[%s1592_s0 + $0x8] sm:$0xff]  ;;  %v1082_v20 = vld [vmem:[%s1591_s1 + $0x61] ss:$0 sm:$0xff] }
   0x5   :  { %1276 = vmatpush3.bf16.msra.mxu1 %v1422_v9  ;;  %1269 = vmatpush3.bf16.msra.mxu0 %v1266_v5 }
   0x6   :  { %1277 = vmatprep.subr.bf16.mxu1 %v1381_v0  ;;  %1271 = vmatprep.subr.bf16.mxu0 %v1270_v10 }
   0x7   :  { %201 = vrot.lane.b32.xlu0 %v1085_v14, %s1384_s29 }
   0x9   :  { %1279 = vmatpush3.bf16.msra.mxu1 %v1438_v15  ;;  %1273 = vmatpush3.bf16.msra.mxu0 %v1270_v10 }
   0xa   :  { %1280 = vmatprep.subr.bf16.mxu0 %v1381_v0  ;;  %1286 = vmatprep.subr.bf16.mxu1 %v1381_v0 }
   0xc   :  { %1176 = vmatmul.mubr.f32.vlgmr.msra.gmra.mrb[0].mxu1 %v1383_v4  ;;  %1165 = vmatmul.mubr.msk.f32.vlgmr.msra.gmra.mrb[0].mxu0 %vm34_vm1, %v29_v16 }
   0xd   :  { %1282 = vmatpush3.bf16.msra.mxu0 %v1422_v9  ;;  %1186 = vmatprep.mubr.msk.f32.mxu0 %vm1382_vm0, %v1383_v4 }
   0xe   :  { %1283 = vmatprep.subr.bf16.mxu0 %v1381_v0  ;;  %1288 = vmatpush3.bf16.msra.mxu1 %v1422_v9 }
   0xf   :  { %1289 = vmatprep.subr.bf16.mxu1 %v1381_v0  ;;  %1197 = vmatprep.mubr.msk.f32.mxu1 %vm1382_vm0, %v1383_v4 }
  0x11   :  { %1285 = vmatpush3.bf16.msra.mxu0 %v1438_v15 }
  0x12   :  { %1291 = vmatpush3.bf16.msra.mxu1 %v1438_v15  ;;  %1292 = vmatprep.subr.bf16.mxu0 %v1381_v0 }
  0x13   :  { %1298 = vmatprep.subr.bf16.mxu1 %v1381_v0 }
  0x79   :  { %v1462_v17 = vpop.permute.xlu0 %201 }
  0xdf   :  { %v189_v18 = vpop.f32.mrb[0].mxu1  ;;  %v1166_v19 = vpop.f32.mrb[0].mxu0 }
  0xe0   :  { %v204_v21 = vadd.f32 %v1462_v17, %v189_v18  ;;  %v1468_v22 = vadd.f32 %v1166_v19, %v1082_v20  ;;  %v1177_v23 = vpop.f32.mrb[1].mxu1  ;;  %v107_v24 = vpop.f32.mrb[1].mxu0 }
  0xe1   :  { %v1471_v25 = vadd.f32 %v1082_v20, %v107_v24 }
  0xe2   :  { %206 = vrot.lane.b32.xlu0 %v204_v21, %s1384_s29 }
  0xe3   :  { %v193_v26 = vadd.f32 %v189_v18, %v1471_v25 }
  0xe5   :  { %v1086_v27 = vmul.f32 -1.442695, %v193_v26 }
  0xe7   :  { %1333 = vpow2.f32 %v1086_v27 }
  0xf1   :  { %v1334_v28 = vpop.eup %1333 }
  0xf2   :  { %v197_v29 = vadd.f32 1.0, %v1334_v28 }
  0xf4   :  { %1335 = vrcp.f32 %v197_v29 }
  0xfe   :  { %v1336_v30 = vpop.eup %1335 }
  0xff   :  { %v216_v36 = vsub.f32 1.0, %v1336_v30  ;;  %v222_v38 = vmul.f32 0.0, %v1336_v30 }
 0x154   :  { %v207_v31 = vpop.permute.xlu0 %206 }
 0x155   :  { %v209_v32 = vmul.f32 %v1336_v30, %v207_v31 }
 0x157   :  { %211 = vrot.lane.b32.xlu1 %v209_v32, %s1384_s29 }
 0x1c9   :  { %v212_v33 = vpop.permute.xlu1 %211 }
 0x1ca   :  { %v214_v34 = vadd.f32 %v212_v33, %v1471_v25 }
 0x1cc   :  { %1337 = vtanh.f32 %v214_v34 }
 0x1d6   :  { %v1338_v35 = vpop.eup %1337 }
 0x1d7   :  { %218 = vrot.lane.b32.xlu1 %v1338_v35, %s1385_s5 }
 0x249   :  { %v219_v37 = vpop.permute.xlu1 %218 }
 0x24a   :  { %v221_v39 = vmul.f32 %v219_v37, %v216_v36 }
 0x24c   :  { %v223_v40 = vadd.f32 %v222_v38, %v221_v39 }
 0x24e   :  { %225 = vrot.lane.b32.xlu0 %v223_v40, %s1385_s5  ;;  %v328_v57 = vrot.slane %v223_v40, 6 }
 0x2c0   :  { %v226_v41 = vpop.permute.xlu0 %225 }
 0x2c1   :  { %1187 = vmatmul.mubr.msk.f32.vlgmr.msra.gmra.mrb[2].mxu0 %vm34_vm1, %v226_v41 }
 0x2c2   :  { %1294 = vmatpush3.bf16.msra.mxu0 %v1422_v9  ;;  %1208 = vmatprep.mubr.msk.f32.mxu0 %vm1382_vm0, %v1383_v4 }
 0x2c3   :  { %1295 = vmatprep.subr.bf16.mxu0 %v1381_v0 }
 0x2c6   :  { %1297 = vmatpush3.bf16.msra.mxu0 %v1438_v15 }
 0x2c7   :  { %1304 = vmatprep.subr.bf16.mxu0 %v1381_v0 }
 0x394   :  { %v295_v42 = vpop.f32.mrb[2].mxu0 }
 0x395   :  { %v309_v43 = vadd.f32 %v295_v42, %v1462_v17  ;;  %v1188_v44 = vpop.f32.mrb[3].mxu0  ;;  %v300_v46 = vrot.slane %v295_v42, 6 }
 0x397   :  { %v311_v45 = vrot.slane %v309_v43, 6  ;;  %v302_v47 = vadd.f32 %v300_v46, %v1471_v25 }
 0x399   :  { %312 = vrot.lane.b32.xlu1 %v311_v45, %s1384_s29  ;;  %v1088_v48 = vmul.f32 -1.442695, %v302_v47 }
 0x39b   :  { %1339 = vpow2.f32 %v1088_v48 }
 0x3a5   :  { %v1340_v49 = vpop.eup %1339 }
 0x3a6   :  { %v306_v50 = vadd.f32 1.0, %v1340_v49 }
 0x3a8   :  { %1341 = vrcp.f32 %v306_v50 }
 0x3b2   :  { %v1342_v51 = vpop.eup %1341 }
 0x3b3   :  { %v322_v58 = vsub.f32 1.0, %v1342_v51  ;;  %v330_v61 = vmul.f32 %v1342_v51, %v328_v57 }
 0x40b   :  { %v313_v52 = vpop.permute.xlu1 %312 }
 0x40c   :  { %v315_v53 = vmul.f32 %v1342_v51, %v313_v52 }
 0x40e   :  { %317 = vrot.lane.b32.xlu0 %v315_v53, %s1384_s29 }
 0x480   :  { %v318_v54 = vpop.permute.xlu0 %317 }
 0x481   :  { %v320_v55 = vadd.f32 %v318_v54, %v1471_v25 }
 0x483   :  { %1343 = vtanh.f32 %v320_v55 }
 0x48d   :  { %v1344_v56 = vpop.eup %1343 }
 0x48e   :  { %324 = vrot.lane.b32.xlu1 %v1344_v56, %s1385_s5 }
 0x500   :  { %v325_v59 = vpop.permute.xlu1 %324 }
 0x501   :  { %v327_v60 = vmul.f32 %v325_v59, %v322_v58 }
 0x503   :  { %v331_v62 = vadd.f32 %v330_v61, %v327_v60 }
 0x505   :  { %v333_v63 = vrot.slane %v331_v62, 2  ;;  %v437_v21 = vrot.slane %v331_v62, 6 }
 0x507   :  { %334 = vrot.lane.b32.xlu0 %v333_v63, %s1385_s5 }
 0x579   :  { %v335_v1 = vpop.permute.xlu0 %334 }
 0x57a   :  { %1198 = vmatmul.mubr.msk.f32.vlgmr.msra.gmra.mrb[2].mxu1 %vm34_vm1, %v335_v1 }
 0x57b   :  { %1300 = vmatpush3.bf16.msra.mxu1 %v1422_v9  ;;  %1219 = vmatprep.mubr.msk.f32.mxu1 %vm1382_vm0, %v1383_v4 }
 0x57c   :  { %1301 = vmatprep.subr.bf16.mxu1 %v1381_v0 }
 0x57f   :  { %1303 = vmatpush3.bf16.msra.mxu1 %v1438_v15 }
 0x580   :  { %1310 = vmatprep.subr.bf16.mxu1 %v1381_v0 }
 0x64d   :  { %v404_v2 = vpop.f32.mrb[2].mxu1 }
 0x64e   :  { %v418_v3 = vadd.f32 %v404_v2, %v1462_v17  ;;  %v1199_v5 = vpop.f32.mrb[3].mxu1  ;;  %v409_v7 = vrot.slane %v404_v2, 4 }
 0x650   :  { %v420_v6 = vrot.slane %v418_v3, 4  ;;  %v411_v8 = vadd.f32 %v409_v7, %v1471_v25 }
 0x652   :  { %421 = vrot.lane.b32.xlu1 %v420_v6, %s1384_s29  ;;  %v1090_v10 = vmul.f32 -1.442695, %v411_v8 }
 0x654   :  { %1345 = vpow2.f32 %v1090_v10 }
 0x65e   :  { %v1346_v11 = vpop.eup %1345 }
 0x65f   :  { %v415_v12 = vadd.f32 1.0, %v1346_v11 }
 0x661   :  { %1347 = vrcp.f32 %v415_v12 }
 0x66b   :  { %v1348_v13 = vpop.eup %1347 }
 0x66c   :  { %v431_v23 = vsub.f32 1.0, %v1348_v13  ;;  %v439_v26 = vmul.f32 %v1348_v13, %v437_v21 }
 0x6c4   :  { %v422_v14 = vpop.permute.xlu1 %421 }
 0x6c5   :  { %v424_v16 = vmul.f32 %v1348_v13, %v422_v14 }
 0x6c7   :  { %426 = vrot.lane.b32.xlu0 %v424_v16, %s1384_s29 }
 0x739   :  { %v427_v18 = vpop.permute.xlu0 %426 }
 0x73a   :  { %v429_v19 = vadd.f32 %v427_v18, %v1471_v25 }
 0x73c   :  { %1349 = vtanh.f32 %v429_v19 }
 0x746   :  { %v1350_v20 = vpop.eup %1349 }
 0x747   :  { %433 = vrot.lane.b32.xlu1 %v1350_v20, %s1385_s5 }
 0x7b9   :  { %v434_v24 = vpop.permute.xlu1 %433 }
 0x7ba   :  { %v436_v27 = vmul.f32 %v434_v24, %v431_v23 }
 0x7bc   :  { %v440_v28 = vadd.f32 %v439_v26, %v436_v27 }
 0x7be   :  { %v442_v29 = vrot.slane %v440_v28, 4  ;;  %v546_v46 = vrot.slane %v440_v28, 6 }
 0x7c0   :  { %443 = vrot.lane.b32.xlu0 %v442_v29, %s1385_s5 }
 0x832   :  { %v444_v30 = vpop.permute.xlu0 %443 }
 0x833   :  { %1209 = vmatmul.mubr.msk.f32.vlgmr.msra.gmra.mrb[4].mxu0 %vm34_vm1, %v444_v30 }
 0x834   :  { %1306 = vmatpush3.bf16.msra.mxu0 %v1422_v9  ;;  %1230 = vmatprep.mubr.msk.f32.mxu0 %vm1382_vm0, %v1383_v4 }
 0x835   :  { %1307 = vmatprep.subr.bf16.mxu0 %v1381_v0 }
 0x838   :  { %1309 = vmatpush3.bf16.msra.mxu0 %v1438_v15 }
 0x839   :  { %1316 = vmatprep.subr.bf16.mxu0 %v1381_v0 }
 0x906   :  { %v513_v31 = vpop.f32.mrb[4].mxu0 }
 0x907   :  { %v527_v32 = vadd.f32 %v513_v31, %v1462_v17  ;;  %v1210_v33 = vpop.f32.mrb[5].mxu0  ;;  %v518_v35 = vrot.slane %v513_v31, 2 }
 0x909   :  { %v529_v34 = vrot.slane %v527_v32, 2  ;;  %v520_v36 = vadd.f32 %v518_v35, %v1471_v25 }
 0x90b   :  { %530 = vrot.lane.b32.xlu1 %v529_v34, %s1384_s29  ;;  %v1092_v37 = vmul.f32 -1.442695, %v520_v36 }
 0x90d   :  { %1351 = vpow2.f32 %v1092_v37 }
 0x917   :  { %v1352_v38 = vpop.eup %1351 }
 0x918   :  { %v524_v39 = vadd.f32 1.0, %v1352_v38 }
 0x91a   :  { %1353 = vrcp.f32 %v524_v39 }
 0x924   :  { %v1354_v40 = vpop.eup %1353 }
 0x925   :  { %v540_v47 = vsub.f32 1.0, %v1354_v40  ;;  %v548_v49 = vmul.f32 %v1354_v40, %v546_v46 }
 0x97d   :  { %v531_v41 = vpop.permute.xlu1 %530 }
 0x97e   :  { %v533_v42 = vmul.f32 %v1354_v40, %v531_v41 }
 0x980   :  { %535 = vrot.lane.b32.xlu0 %v533_v42, %s1384_s29 }
 0x9f2   :  { %v536_v43 = vpop.permute.xlu0 %535 }
 0x9f3   :  { %v538_v44 = vadd.f32 %v536_v43, %v1471_v25 }
 0x9f5   :  { %1355 = vtanh.f32 %v538_v44 }
 0x9ff   :  { %v1356_v45 = vpop.eup %1355 }
 0xa00   :  { %542 = vrot.lane.b32.xlu1 %v1356_v45, %s1385_s5 }
 0xa72   :  { %v543_v48 = vpop.permute.xlu1 %542 }
 0xa73   :  { %v545_v50 = vmul.f32 %v543_v48, %v540_v47 }
 0xa75   :  { %v549_v51 = vadd.f32 %v548_v49, %v545_v50 }
 0xa77   :  { %v551_v52 = vrot.slane %v549_v51, 6 }
 0xa79   :  { %552 = vrot.lane.b32.xlu0 %v551_v52, %s1385_s5 }
 0xaeb   :  { %v553_v53 = vpop.permute.xlu0 %552 }
 0xaec   :  { %1220 = vmatmul.mubr.msk.f32.vlgmr.msra.gmra.mrb[4].mxu1 %vm34_vm1, %v553_v53 }
 0xaed   :  { %1312 = vmatpush3.bf16.msra.mxu1 %v1422_v9  ;;  %1241 = vmatprep.mubr.msk.f32.mxu1 %vm1382_vm0, %v1383_v4 }
 0xaee   :  { %1313 = vmatprep.subr.bf16.mxu1 %v1381_v0 }
 0xaf1   :  { %1315 = vmatpush3.bf16.msra.mxu1 %v1438_v15 }
 0xaf2   :  { %1322 = vmatprep.subr.bf16.mxu1 %v1381_v0 }
 0xbbf   :  { %v622_v25 = vpop.f32.mrb[4].mxu1 }
 0xbc0   :  { %v633_v54 = vadd.f32 %v622_v25, %v1462_v17  ;;  %v1221_v55 = vpop.f32.mrb[5].mxu1  ;;  %v626_v56 = vadd.f32 %v622_v25, %v1468_v22 }
 0xbc2   :  { %635 = vrot.lane.b32.xlu1 %v633_v54, %s1384_s29  ;;  %v1094_v57 = vmul.f32 -1.442695, %v626_v56 }
 0xbc4   :  { %1357 = vpow2.f32 %v1094_v57 }
 0xbce   :  { %v1358_v58 = vpop.eup %1357 }
 0xbcf   :  { %v630_v59 = vadd.f32 1.0, %v1358_v58 }
 0xbd1   :  { %1359 = vrcp.f32 %v630_v59 }
 0xbdb   :  { %v1360_v60 = vpop.eup %1359 }
 0xbdc   :  { %v645_v3 = vsub.f32 1.0, %v1360_v60  ;;  %v652_v6 = vmul.f32 %v1360_v60, %v551_v52 }
 0xc34   :  { %v636_v61 = vpop.permute.xlu1 %635 }
 0xc35   :  { %v638_v62 = vmul.f32 %v1360_v60, %v636_v61 }
 0xc37   :  { %640 = vrot.lane.b32.xlu0 %v638_v62, %s1384_s29 }
 0xca9   :  { %v641_v63 = vpop.permute.xlu0 %640 }
 0xcaa   :  { %v643_v1 = vadd.f32 %v641_v63, %v1468_v22 }
 0xcac   :  { %1361 = vtanh.f32 %v643_v1 }
 0xcb6   :  { %v1362_v2 = vpop.eup %1361 }
 0xcb7   :  { %647 = vrot.lane.b32.xlu1 %v1362_v2, %s1385_s5 }
 0xd29   :  { %v648_v5 = vpop.permute.xlu1 %647 }
 0xd2a   :  { %v650_v7 = vmul.f32 %v648_v5, %v645_v3 }
 0xd2c   :  { %v653_v8 = vadd.f32 %v652_v6, %v650_v7 }
 0xd2e   :  { %655 = vrot.lane.b32.xlu0 %v653_v8, %s1385_s5  ;;  %v758_v28 = vrot.slane %v653_v8, 6  ;;  %v19_v8 = vld [vmem:[%s1591_s1 + $0x40] sm:$0xff] }
 0xda0   :  { %v656_v10 = vpop.permute.xlu0 %655 }
 0xda1   :  { %1231 = vmatmul.mubr.msk.f32.vlgmr.msra.gmra.mrb[6].mxu0 %vm34_vm1, %v656_v10  ;;  %v20_v10 = vld [vmem:[%s1591_s1 + $0x48] sm:$0xff] }
 0xda2   :  { %1318 = vmatpush3.bf16.msra.mxu0 %v1422_v9  ;;  %1252 = vmatprep.mubr.msk.f32.mxu0 %vm1382_vm0, %v1383_v4 }
 0xda3   :  { %1319 = vmatprep.subr.bf16.mxu0 %v1381_v0 }
 0xda6   :  { %1321 = vmatpush3.bf16.msra.mxu0 %v1438_v15 }
 0xe74   :  { %v725_v11 = vpop.f32.mrb[6].mxu0 }
 0xe75   :  { %v739_v12 = vadd.f32 %v725_v11, %v1462_v17  ;;  %v1232_v13 = vpop.f32.mrb[7].mxu0  ;;  %v730_v16 = vrot.slane %v725_v11, 6  ;;  %v21_v11 = vld [vmem:[%s1591_s1 + $0x50] sm:$0xff] }
 0xe76   :  { %v22_v13 = vld [vmem:[%s1591_s1 + $0x58] sm:$0xff] }
 0xe77   :  { %v741_v14 = vrot.slane %v739_v12, 6  ;;  %v732_v18 = vadd.f32 %v730_v16, %v1468_v22  ;;  %v1323_v12 = vpack.c.bf16 %v20_v10, %v19_v8 }
 0xe79   :  { %742 = vrot.lane.b32.xlu1 %v741_v14, %s1384_s29  ;;  %v1096_v19 = vmul.f32 -1.442695, %v732_v18 }
 0xe7b   :  { %1363 = vpow2.f32 %v1096_v19 }
 0xe85   :  { %v1364_v9 = vpop.eup %1363 }
 0xe86   :  { %v736_v20 = vadd.f32 1.0, %v1364_v9 }
 0xe88   :  { %1365 = vrcp.f32 %v736_v20 }
 0xe92   :  { %v1366_v21 = vpop.eup %1365 }
 0xe93   :  { %v752_v29 = vsub.f32 1.0, %v1366_v21  ;;  %v760_v32 = vmul.f32 %v1366_v21, %v758_v28  ;;  %v1103_v28 = vld [vmem:[%s1591_s1 + $0x60] ss:$0 sm:$0xff] }
 0xeeb   :  { %v743_v23 = vpop.permute.xlu1 %742 }
 0xeec   :  { %v745_v24 = vmul.f32 %v1366_v21, %v743_v23 }
 0xeee   :  { %747 = vrot.lane.b32.xlu0 %v745_v24, %s1384_s29 }
 0xf60   :  { %v748_v15 = vpop.permute.xlu0 %747 }
 0xf61   :  { %v750_v26 = vadd.f32 %v748_v15, %v1468_v22 }
 0xf63   :  { %1367 = vtanh.f32 %v750_v26 }
 0xf6d   :  { %v1368_v27 = vpop.eup %1367 }
 0xf6e   :  { %754 = vrot.lane.b32.xlu1 %v1368_v27, %s1385_s5 }
 0xfe0   :  { %v755_v30 = vpop.permute.xlu1 %754 }
 0xfe1   :  { %v757_v31 = vmul.f32 %v755_v30, %v752_v29 }
 0xfe3   :  { %v761_v33 = vadd.f32 %v760_v32, %v757_v31  ;;  %v1104_v32 = vld [vmem:[%s1591_s1 + $0x64] ss:$0 sm:$0xff] }
 0xfe5   :  { %v763_v34 = vrot.slane %v761_v33, 2  ;;  %v867_v50 = vrot.slane %v761_v33, 6 }
 0xfe7   :  { %764 = vrot.lane.b32.xlu0 %v763_v34, %s1385_s5 }
0x1059   :  { %v765_v35 = vpop.permute.xlu0 %764 }
0x105a   :  { %1242 = vmatmul.mubr.msk.f32.vlgmr.msra.gmra.mrb[6].mxu1 %vm34_vm1, %v765_v35 }
0x105b   :  { %1263 = vmatprep.mubr.msk.f32.mxu1 %vm1382_vm0, %v1383_v4  ;;  %1324 = vmatpush3.bf16.msra.mxu1 %v1323_v12 }
0x105c   :  { %1325 = vmatprep.subr.bf16.mxu1 %v1381_v0  ;;  %v1101_v0 = vld [vmem:[%s1591_s1 + $0x63] ss:$0 sm:$0xff] }
0x112d   :  { %v834_v36 = vpop.f32.mrb[6].mxu1 }
0x112e   :  { %v848_v37 = vadd.f32 %v834_v36, %v1462_v17  ;;  %v1243_v38 = vpop.f32.mrb[7].mxu1  ;;  %v839_v40 = vrot.slane %v834_v36, 4 }
0x1130   :  { %v850_v39 = vrot.slane %v848_v37, 4  ;;  %v841_v41 = vadd.f32 %v839_v40, %v1468_v22 }
0x1132   :  { %851 = vrot.lane.b32.xlu1 %v850_v39, %s1384_s29  ;;  %v1098_v42 = vmul.f32 -1.442695, %v841_v41 }
0x1134   :  { %1369 = vpow2.f32 %v1098_v42 }
0x113e   :  { %v1370_v43 = vpop.eup %1369 }
0x113f   :  { %v845_v44 = vadd.f32 1.0, %v1370_v43 }
0x1141   :  { %1371 = vrcp.f32 %v845_v44 }
0x114b   :  { %v1372_v45 = vpop.eup %1371 }
0x114c   :  { %v861_v51 = vsub.f32 1.0, %v1372_v45  ;;  %v869_v53 = vmul.f32 %v1372_v45, %v867_v50 }
0x11a4   :  { %v852_v46 = vpop.permute.xlu1 %851 }
0x11a5   :  { %v854_v47 = vmul.f32 %v1372_v45, %v852_v46 }
0x11a7   :  { %856 = vrot.lane.b32.xlu0 %v854_v47, %s1384_s29 }
0x1219   :  { %v857_v4 = vpop.permute.xlu0 %856 }
0x121a   :  { %v859_v48 = vadd.f32 %v857_v4, %v1468_v22 }
0x121c   :  { %1373 = vtanh.f32 %v859_v48 }
0x1226   :  { %v1374_v49 = vpop.eup %1373 }
0x1227   :  { %863 = vrot.lane.b32.xlu1 %v1374_v49, %s1385_s5 }
0x1299   :  { %v864_v52 = vpop.permute.xlu1 %863 }
0x129a   :  { %v866_v25 = vmul.f32 %v864_v52, %v861_v51 }
0x129c   :  { %v870_v54 = vadd.f32 %v869_v53, %v866_v25 }
0x129e   :  { %v872_v55 = vrot.slane %v870_v54, 4  ;;  %v976_v16 = vrot.slane %v870_v54, 6 }
0x12a0   :  { %873 = vrot.lane.b32.xlu0 %v872_v55, %s1385_s5 }
0x1312   :  { %v874_v56 = vpop.permute.xlu0 %873 }
0x1313   :  { %1253 = vmatmul.mubr.msk.f32.vlgmr.msra.gmra.mrb[8].mxu0 %vm34_vm1, %v874_v56 }
0x13e6   :  { %v943_v57 = vpop.f32.mrb[8].mxu0 }
0x13e7   :  { %v957_v58 = vadd.f32 %v943_v57, %v1462_v17  ;;  %v1254_v59 = vpop.f32.mrb[9].mxu0  ;;  %v948_v61 = vrot.slane %v943_v57, 2 }
0x13e9   :  { %v959_v60 = vrot.slane %v957_v58, 2  ;;  %v950_v62 = vadd.f32 %v948_v61, %v1468_v22 }
0x13eb   :  { %960 = vrot.lane.b32.xlu1 %v959_v60, %s1384_s29  ;;  %v1100_v63 = vmul.f32 -1.442695, %v950_v62 }
0x13ed   :  { %1375 = vpow2.f32 %v1100_v63 }
0x13f7   :  { %v1376_v1 = vpop.eup %1375 }
0x13f8   :  { %v954_v2 = vadd.f32 1.0, %v1376_v1 }
0x13fa   :  { %1377 = vrcp.f32 %v954_v2 }
0x1404   :  { %v1378_v3 = vpop.eup %1377 }
0x1405   :  { %v970_v18 = vsub.f32 1.0, %v1378_v3  ;;  %v978_v9 = vmul.f32 %v1378_v3, %v976_v16 }
0x145d   :  { %v961_v5 = vpop.permute.xlu1 %960 }
0x145e   :  { %v963_v6 = vmul.f32 %v1378_v3, %v961_v5 }
0x1460   :  { %965 = vrot.lane.b32.xlu0 %v963_v6, %s1384_s29 }
0x14d2   :  { %v966_v7 = vpop.permute.xlu0 %965 }
0x14d3   :  { %v968_v17 = vadd.f32 %v966_v7, %v1468_v22  ;;  %v1326_v22 = vpack.c.bf16 %v22_v13, %v21_v11 }
0x14d5   :  { %1379 = vtanh.f32 %v968_v17  ;;  %1327 = vmatpush3.bf16.msra.mxu1 %v1326_v22 }
0x14df   :  { %v1380_v14 = vpop.eup %1379 }
0x14e0   :  { %972 = vrot.lane.b32.xlu1 %v1380_v14, %s1385_s5 }
0x1552   :  { %v973_v19 = vpop.permute.xlu1 %972 }
0x1553   :  { %v975_v20 = vmul.f32 %v973_v19, %v970_v18 }
0x1555   :  { %v979_v21 = vadd.f32 %v978_v9, %v975_v20 }
0x1557   :  { %v985_v23 = vrot.slane %v979_v21, 6 }
0x1559   :  { %986 = vrot.lane.b32.xlu0 %v985_v23, %s1385_s5 }
0x15cb   :  { %v987_v24 = vpop.permute.xlu0 %986 }
0x15cc   :  { %1264 = vmatmul.mubr.msk.f32.vlgmr.msra.gmra.mrb[8].mxu1 %vm34_vm1, %v987_v24 }
0x169f   :  { %v1056_v15 = vpop.f32.mrb[8].mxu1 }
0x16a0   :  { %v1057_v26 = vadd.f32 %v1101_v0, %v1056_v15  ;;  %v1265_v27 = vpop.f32.mrb[9].mxu1 }
0x16a2   :  { %v1060_v29 = vmax.f32 %v1057_v26, 0.0 }
0x16a4   :  { %v1065_v30 = vmul.f32 %v1103_v28, %v1060_v29 }
0x16a6   :  { %v1067_v31 = vsel %vm1066_vm2, %v1065_v30, 0.0 }
0x16a7   :  { %1068 = vadd.xlane.f32.xlu1 %v1067_v31 }
0x1734   :  { %v1069_v33 = vpop.xlane.xlu1 %1068 }
0x1735   :  { %v1074_v34 = vadd.f32 %v1104_v32, %v1069_v33 }
0x1737   :  { %v1075_v35 = vmax.f32 %v1074_v34, 0.0 }
0x1739   :  { %1077 = vst.msk [vmem:[%s1593_s2] sm:$0x3] %vm1076_vm3, %v1075_v35 }

</bundles_post_ra>
